<compile_context>
chip_gen: v7x
topology: tpu7x:2x2x1
jax: 0.10.0
libtpu: 0.0.40
codegen_flags: <defaults>
</compile_context>

<pallas_src>
import functools

import jax
import jax.numpy as jnp
from jax.experimental import pallas as pl
from jax.experimental.pallas import tpu as pltpu


# ----------------------------- tiling policy ---------------------------------

_TARGET_BLOCK_BYTES = 4 * 1024 * 1024   # per-grid-step scores DMA sweet spot (2-8 MiB)
_MIN_ROW_BLOCKS = 4                     # keep >= 4 row blocks when N permits (megacore + pipelining)

# (tm, 1) blocks are lane-padded to 128 words in VMEM: labels (x2 buffers) +
# m/l/picked scratch (x3) + per-row output (x2 buffers)  ->  7 padded columns per row.
_COL_BYTES_PER_ROW = 7 * 128 * 4


@functools.lru_cache(maxsize=1)
def _vmem_limit_bytes():
    """Generation-aware scoped-VMEM limit (~75% of per-core capacity, clamped)."""
    try:
        cap = int(pltpu.get_tpu_info().vmem_capacity_bytes)
    except Exception:
        cap = 64 * 1024 * 1024          # v7x per-TC capacity as a conservative floor
    return max(32 * 1024 * 1024, min((cap * 3) // 4, 96 * 1024 * 1024))


def _choose_tiles(n_rows, vocab, in_bytes):
    """Pick (tm, tv) row/vocab tile sizes.

    Per-grid-step workset ~= tm*tv*(2*in_bytes [double-buffered input] + 8 [~2 f32 temps])
    + tm*_COL_BYTES_PER_ROW for the lane-padded (tm,1) columns.  Budget = half the
    scoped-VMEM limit, leaving headroom for compiler temporaries.
    """
    budget = _vmem_limit_bytes() // 2
    ws_per_elem = 2 * in_bytes + 8

    # Vocab tile: keep the whole vocab per step when an 8-row workset fits the budget,
    # otherwise tile the vocab axis (multiple of 128) and run online softmax across it.
    row_budget = budget // 8
    if vocab * ws_per_elem + _COL_BYTES_PER_ROW <= row_budget or vocab <= 128:
        tv = int(vocab)
    else:
        tv = (row_budget - _COL_BYTES_PER_ROW) // ws_per_elem // 128 * 128
        tv = int(max(128, min(tv, (vocab // 128) * 128)))

    # Row tile: bounded by the VMEM workset, by the DMA sweet spot, by >= _MIN_ROW_BLOCKS
    # row blocks (pipelining + v7x megacore), and by the array itself (no block > array).
    row_bytes = tv * ws_per_elem + _COL_BYTES_PER_ROW
    tm_vmem = budget // row_bytes // 8 * 8
    tm_dma = _TARGET_BLOCK_BYTES // (tv * in_bytes) // 8 * 8
    tm_par = n_rows // _MIN_ROW_BLOCKS // 8 * 8
    tm_arr = n_rows // 8 * 8
    tm = max(8, min(tm_vmem, max(8, tm_dma), max(8, tm_par), max(8, tm_arr)))
    return int(tm), int(tv)


# ------------------------------- kernels --------------------------------------

def _online_softmax_step(scores_ref, labels_ref, m_ref, l_ref, p_ref, *, vocab, tv):
    """One vocab-tile step of the masked online-softmax cross entropy.

    Per-row running state (f32 VMEM scratch):
      m_ref: running max of logits, l_ref: running sum(exp(logit - m)),
      p_ref: target-class logit (accumulated; exactly one vocab tile contributes).
    """
    j = pl.program_id(1)

    @pl.when(j == 0)
    def _():
        m_ref[...] = jnp.full_like(m_ref, -jnp.inf)
        l_ref[...] = jnp.zeros_like(l_ref)
        p_ref[...] = jnp.zeros_like(p_ref)

    s_raw = scores_ref[...]            # (tm, tv), raw input dtype (f32 or bf16)
    labels = labels_ref[...]           # (tm, 1) int32

    # In-tile column index; compare against (label - j*tv) / (vocab - j*tv) so the tile
    # offset stays a per-row / scalar op rather than a per-element add.
    col = jax.lax.broadcasted_iota(jnp.int32, s_raw.shape, 1)

    if vocab % tv != 0:
        # Last vocab block overhangs: neutralize out-of-range columns for max / exp.
        s_eff = jnp.where(col < vocab - j * tv, s_raw, jnp.asarray(-jnp.inf, s_raw.dtype))
    else:
        s_eff = s_raw

    # Max and target gather in the raw dtype (exact); upcast to f32 only for the exp path.
    tile_max = jnp.max(s_eff, axis=-1, keepdims=True).astype(jnp.float32)
    m_old = m_ref[...]
    m_new = jnp.maximum(m_old, tile_max)

    s32 = s_eff.astype(jnp.float32)
    l_ref[...] = l_ref[...] * jnp.exp(m_old - m_new) + jnp.sum(
        jnp.exp(s32 - m_new), axis=-1, keepdims=True)

    picked = jnp.sum(
        jnp.where(col == labels - j * tv, s_raw, jnp.zeros((), s_raw.dtype)),
        axis=-1, keepdims=True)
    p_ref[...] = p_ref[...] + picked.astype(jnp.float32)
    m_ref[...] = m_new


def _finalize_rows(labels, m, l, p, *, pad):
    """(per_row_loss, valid) for one row block; ignored / overhang rows -> 0 via where."""
    lse = m + jnp.log(l)
    valid = labels != pad
    per_row = jnp.where(valid, lse - p, 0.0)
    return per_row, valid.astype(jnp.float32)


def _ce_sum_kernel(scores_ref, labels_ref, out_ref, m_ref, l_ref, p_ref, *, pad, vocab, tv):
    """redu=True: per-row-block packed partial (loss_sum, valid_count) in one (1,1,2) block."""
    _online_softmax_step(scores_ref, labels_ref, m_ref, l_ref, p_ref, vocab=vocab, tv=tv)

    @pl.when(pl.program_id(1) == pl.num_programs(1) - 1)
    def _():
        per_row, valid = _finalize_rows(labels_ref[...], m_ref[...], l_ref[...], p_ref[...],
                                        pad=pad)
        # Pack (loss_sum, count) into a single tiny output DMA per row block.
        lane = jax.lax.broadcasted_iota(jnp.int32, (per_row.shape[0], 2), 1)
        stats = jnp.where(lane == 0, per_row, valid)                    # (tm, 2)
        out_ref[...] = jnp.sum(stats, axis=0, keepdims=True).reshape(1, 1, 2)


def _ce_rows_kernel(scores_ref, labels_ref, out_ref, m_ref, l_ref, p_ref, *, pad, vocab, tv):
    """redu=False: per-row losses (ignored rows -> 0), matching torch reduce=False."""
    _online_softmax_step(scores_ref, labels_ref, m_ref, l_ref, p_ref, vocab=vocab, tv=tv)

    @pl.when(pl.program_id(1) == pl.num_programs(1) - 1)
    def _():
        per_row, _ = _finalize_rows(labels_ref[...], m_ref[...], l_ref[...], p_ref[...],
                                    pad=pad)
        out_ref[...] = per_row


# ------------------------------- wrappers --------------------------------------

def _prep(scores, gtruth, *, pad, tm, tv):
    n, vocab = scores.shape
    if n < 8:
        # Tiny corner only: keep the row block within the array (pad cost negligible).
        scores = jnp.pad(scores, ((0, 8 - n), (0, 0)))
    n_eff = max(n, 8)

    tm_auto, tv_auto = _choose_tiles(n_eff, vocab, jnp.dtype(scores.dtype).itemsize)
    tm = tm_auto if tm is None else int(tm)
    tv = tv_auto if tv is None else int(tv)
    assert tm % 8 == 0 and 8 <= tm <= max(8, (n_eff // 8) * 8), tm
    assert tv == vocab or (tv % 128 == 0 and 128 <= tv <= vocab), tv

    nb = (n_eff + tm - 1) // tm
    nv = (vocab + tv - 1) // tv

    # Only the tiny int32 label column is padded (with `pad`) up to the block grid so the
    # ignore_index mask also drops the overhanging score rows.  The big logits tensor is
    # NOT padded/copied in HBM — its last row/vocab blocks overhang and are masked in-kernel.
    labels = gtruth.astype(jnp.int32).reshape(n, 1)
    labels = jnp.pad(labels, ((0, nb * tm - n), (0, 0)), constant_values=pad)
    return scores, labels, n, vocab, tm, tv, nb, nv


def _in_specs(tm, tv):
    return [
        pl.BlockSpec((tm, tv), lambda i, j: (i, j)),
        pl.BlockSpec((tm, 1), lambda i, j: (i, 0)),   # label block resident across vocab steps
    ]


def cross_entropy_mean_pallas(scores, gtruth, *, pad, tm=None, tv=None):
    """Mean cross entropy over non-ignored targets (torch CrossEntropyLoss reduce=True)."""
    scores, labels, n, vocab, tm, tv, nb, nv = _prep(scores, gtruth, pad=pad, tm=tm, tv=tv)
    kernel = functools.partial(_ce_sum_kernel, pad=pad, vocab=vocab, tv=tv)
    parts = pl.pallas_call(
        kernel,
        out_shape=jax.ShapeDtypeStruct((nb, 1, 2), jnp.float32),
        grid_spec=pltpu.PrefetchScalarGridSpec(
            num_scalar_prefetch=0,
            grid=(nb, nv),
            in_specs=_in_specs(tm, tv),
            out_specs=pl.BlockSpec((1, 1, 2), lambda i, j: (i, 0, 0)),
            scratch_shapes=[pltpu.VMEM((tm, 1), jnp.float32)] * 3,   # m, l, picked
        ),
        compiler_params=pltpu.CompilerParams(
            dimension_semantics=("parallel", "arbitrary"),   # rows megacore-shardable
            vmem_limit_bytes=_vmem_limit_bytes(),
        ),
    )(scores, labels)
    loss_sum = jnp.sum(parts[:, 0, 0])
    count = jnp.sum(parts[:, 0, 1])
    # NOTE: torch returns NaN when every target equals ignore_index; we return 0 instead.
    return loss_sum / jnp.maximum(count, 1.0)


def cross_entropy_per_row_pallas(scores, gtruth, *, pad, tm=None, tv=None):
    """Per-element losses (torch CrossEntropyLoss reduce=False); ignored positions -> 0."""
    scores, labels, n, vocab, tm, tv, nb, nv = _prep(scores, gtruth, pad=pad, tm=tm, tv=tv)
    kernel = functools.partial(_ce_rows_kernel, pad=pad, vocab=vocab, tv=tv)
    per_row = pl.pallas_call(
        kernel,
        out_shape=jax.ShapeDtypeStruct((nb * tm, 1), jnp.float32),
        grid_spec=pltpu.PrefetchScalarGridSpec(
            num_scalar_prefetch=0,
            grid=(nb, nv),
            in_specs=_in_specs(tm, tv),
            out_specs=pl.BlockSpec((tm, 1), lambda i, j: (i, 0)),
            scratch_shapes=[pltpu.VMEM((tm, 1), jnp.float32)] * 3,
        ),
        compiler_params=pltpu.CompilerParams(
            dimension_semantics=("parallel", "arbitrary"),
            vmem_limit_bytes=_vmem_limit_bytes(),
        ),
    )(scores, labels)
    return per_row[:n, 0]


class HybridPallas:
    """Mirror of the PyTorch `hybrid` module (alpha == 0 path)."""

    def __init__(self, pad, redu):
        self.pad = pad
        self.redu = redu
        self.k = 20
        self.alpha = 0
        # TODO(synk): duploss() (gather of softmax probs at previous argmax ids) is
        # unreachable because alpha == 0 in __init__; not implemented.

    def forward(self, scores, gtruth, pred=None):
        if self.redu:
            cross = cross_entropy_mean_pallas(scores, gtruth, pad=self.pad)
        else:
            cross = cross_entropy_per_row_pallas(scores, gtruth, pad=self.pad)
        local = 0.0  # alpha == 0 branch
        return cross, local


# ------------------------------- test harness ----------------------------------

def _reference_per_row(scores, gtruth, pad):
    logp = jax.nn.log_softmax(scores.astype(jnp.float32), axis=-1)
    nll = -jnp.take_along_axis(logp, gtruth[:, None].astype(jnp.int32), axis=-1)[:, 0]
    valid = (gtruth != pad).astype(jnp.float32)
    return nll * valid, valid


if __name__ == "__main__":
    key = jax.random.PRNGKey(0)
    k1, k2 = jax.random.split(key)

    batch, seq, vocab = 2, 9, 200      # N = 18 (not mult of 8), V = 200 (not mult of 128)
    pad = 0
    N = batch * seq                    # scores flattened to (N, vocab), as CrossEntropyLoss expects

    scores = jax.random.normal(k1, (N, vocab), dtype=jnp.float32)
    gtruth = jax.random.randint(k2, (N,), 0, vocab, dtype=jnp.int32)
    gtruth = gtruth.at[3].set(pad).at[10].set(pad)      # exercise ignore_index
    pred = jax.random.normal(key, (seq, batch, vocab), dtype=jnp.float32)  # unused (alpha == 0)

    nll_ref, valid_ref = _reference_per_row(scores, gtruth, pad)
    mean_ref = jnp.sum(nll_ref) / jnp.maximum(jnp.sum(valid_ref), 1.0)

    # redu=True, auto tiles (single vocab tile, overhanging last row block, no scores pad)
    mod_mean = HybridPallas(pad=pad, redu=True)
    cross_mean, local = mod_mean.forward(scores, gtruth, pred)
    cross_mean = jax.block_until_ready(cross_mean)
    assert jnp.allclose(cross_mean, mean_ref, rtol=1e-5, atol=1e-5), (cross_mean, mean_ref)
    assert local == 0.0

    # redu=True, forced small tiles: multi-block rows AND vocab -> exercises the online
    # softmax accumulation plus both row-axis and vocab-axis overhang masking.
    cross_tiled = cross_entropy_mean_pallas(scores, gtruth, pad=pad, tm=8, tv=128)
    cross_tiled = jax.block_until_ready(cross_tiled)
    assert jnp.allclose(cross_tiled, mean_ref, rtol=1e-5, atol=1e-5), (cross_tiled, mean_ref)

    # redu=False: per-element losses (ignored -> 0), auto and forced tiles
    mod_row = HybridPallas(pad=pad, redu=False)
    cross_rows, _ = mod_row.forward(scores, gtruth, pred)
    cross_rows = jax.block_until_ready(cross_rows)
    assert jnp.allclose(cross_rows, nll_ref, rtol=1e-5, atol=1e-5)

    rows_tiled = cross_entropy_per_row_pallas(scores, gtruth, pad=pad, tm=8, tv=128)
    rows_tiled = jax.block_until_ready(rows_tiled)
    assert jnp.allclose(rows_tiled, nll_ref, rtol=1e-5, atol=1e-5)

    # bf16 logits fed straight in (kernel upcasts internally only for the exp path)
    scores_bf16 = scores.astype(jnp.bfloat16)
    nll_bf, valid_bf = _reference_per_row(scores_bf16.astype(jnp.float32), gtruth, pad)
    mean_bf = jnp.sum(nll_bf) / jnp.maximum(jnp.sum(valid_bf), 1.0)
    cross_bf = cross_entropy_mean_pallas(scores_bf16, gtruth, pad=pad)
    cross_bf = jax.block_until_ready(cross_bf)
    assert jnp.allclose(cross_bf, mean_bf, rtol=1e-4, atol=1e-4), (cross_bf, mean_bf)

    print("KERNEL_OK")
</pallas_src>

<mosaic_0001>
module attributes {stable_mosaic.version = 11 : i64} {
  func.func @_ce_sum_kernel(%arg0: i32, %arg1: i32, %arg2: memref<8x200xf32, #tpu.memory_space<vmem>>, %arg3: memref<8x1xi32, #tpu.memory_space<vmem>>, %arg4: memref<1x1x2xf32, #tpu.memory_space<vmem>>, %arg5: memref<8x1xf32, #tpu.memory_space<vmem>>, %arg6: memref<8x1xf32, #tpu.memory_space<vmem>>, %arg7: memref<8x1xf32, #tpu.memory_space<vmem>>) attributes {dimension_semantics = [#tpu.dimension_semantics<parallel>, #tpu.dimension_semantics<arbitrary>], iteration_bounds = array<i64: 3, 1>, scalar_prefetch = 0 : i64, scratch_operands = 3 : i64, tpu.core_type = #tpu.core_type<tc>, window_params = [{transform_indices = @transform_0, window_bounds = array<i64: 8, 200>}, {transform_indices = @transform_1, window_bounds = array<i64: 8, 1>}, {transform_indices = @transform_2, window_bounds = array<i64: 1, 1, 2>}]} {
    %c0_i32 = arith.constant 0 : i32
    %0 = arith.cmpi eq, %arg1, %c0_i32 : i32
    %1 = arith.extui %0 : i1 to i32
    %c0_i32_0 = arith.constant 0 : i32
    %2 = arith.cmpi ne, %1, %c0_i32_0 : i32
    scf.if %2 {
      %cst_21 = arith.constant 0xFF800000 : f32
      %37 = vector.broadcast %cst_21 : f32 to vector<8x1xf32>
      %c0_22 = arith.constant 0 : index
      %c0_23 = arith.constant 0 : index
      %38 = vector.load %arg5[%c0_22, %c0_23] : memref<8x1xf32, #tpu.memory_space<vmem>>, vector<8x1xf32>
      tpu.vector_store %arg5[%c0_22, %c0_23], %37 {strides = array<i32>} : memref<8x1xf32, #tpu.memory_space<vmem>>, vector<8x1xf32>,
      %cst_24 = arith.constant 0.000000e+00 : f32
      %39 = vector.broadcast %cst_24 : f32 to vector<8x1xf32>
      %c0_25 = arith.constant 0 : index
      %c0_26 = arith.constant 0 : index
      %40 = vector.load %arg6[%c0_25, %c0_26] : memref<8x1xf32, #tpu.memory_space<vmem>>, vector<8x1xf32>
      tpu.vector_store %arg6[%c0_25, %c0_26], %39 {strides = array<i32>} : memref<8x1xf32, #tpu.memory_space<vmem>>, vector<8x1xf32>,
      %cst_27 = arith.constant 0.000000e+00 : f32
      %41 = vector.broadcast %cst_27 : f32 to vector<8x1xf32>
      %c0_28 = arith.constant 0 : index
      %c0_29 = arith.constant 0 : index
      %42 = vector.load %arg7[%c0_28, %c0_29] : memref<8x1xf32, #tpu.memory_space<vmem>>, vector<8x1xf32>
      tpu.vector_store %arg7[%c0_28, %c0_29], %41 {strides = array<i32>} : memref<8x1xf32, #tpu.memory_space<vmem>>, vector<8x1xf32>,
    } else {
    }
    %c0 = arith.constant 0 : index
    %c0_1 = arith.constant 0 : index
    %3 = vector.load %arg2[%c0, %c0_1] : memref<8x200xf32, #tpu.memory_space<vmem>>, vector<8x200xf32>
    %c0_2 = arith.constant 0 : index
    %c0_3 = arith.constant 0 : index
    %4 = vector.load %arg3[%c0_2, %c0_3] : memref<8x1xi32, #tpu.memory_space<vmem>>, vector<8x1xi32>
    %5 = tpu.iota {dimensions = array<i32: 1>} : vector<8x200xi32>
    %cst = arith.constant dense<0xFF800000> : vector<8xf32>
    %6 = vector.multi_reduction <maximumf>, %3, %cst [1] : vector<8x200xf32> to vector<8xf32>
    %7 = vector.shape_cast %6 : vector<8xf32> to vector<8x1xf32>
    %c0_4 = arith.constant 0 : index
    %c0_5 = arith.constant 0 : index
    %8 = vector.load %arg5[%c0_4, %c0_5] : memref<8x1xf32, #tpu.memory_space<vmem>>, vector<8x1xf32>
    %9 = arith.maximumf %8, %7 : vector<8x1xf32>
    %c0_6 = arith.constant 0 : index
    %c0_7 = arith.constant 0 : index
    %10 = vector.load %arg6[%c0_6, %c0_7] : memref<8x1xf32, #tpu.memory_space<vmem>>, vector<8x1xf32>
    %11 = arith.subf %8, %9 : vector<8x1xf32>
    %12 = math.exp %11 : vector<8x1xf32>
    %13 = arith.mulf %10, %12 : vector<8x1xf32>
    %14 = vector.broadcast %9 : vector<8x1xf32> to vector<8x200xf32>
    %15 = arith.subf %3, %14 : vector<8x200xf32>
    %16 = math.exp %15 : vector<8x200xf32>
    %cst_8 = arith.constant dense<0.000000e+00> : vector<8xf32>
    %17 = vector.multi_reduction <add>, %16, %cst_8 [1] : vector<8x200xf32> to vector<8xf32>
    %18 = vector.shape_cast %17 : vector<8xf32> to vector<8x1xf32>
    %19 = arith.addf %13, %18 : vector<8x1xf32>
    %c0_9 = arith.constant 0 : index
    %c0_10 = arith.constant 0 : index
    %20 = vector.load %arg6[%c0_9, %c0_10] : memref<8x1xf32, #tpu.memory_space<vmem>>, vector<8x1xf32>
    tpu.vector_store %arg6[%c0_9, %c0_10], %19 {strides = array<i32>} : memref<8x1xf32, #tpu.memory_space<vmem>>, vector<8x1xf32>,
    %c200_i32 = arith.constant 200 : i32
    %21 = arith.muli %arg1, %c200_i32 : i32
    %22 = vector.broadcast %21 : i32 to vector<8x1xi32>
    %23 = arith.subi %4, %22 : vector<8x1xi32>
    %24 = vector.broadcast %23 : vector<8x1xi32> to vector<8x200xi32>
    %25 = arith.cmpi eq, %5, %24 : vector<8x200xi32>
    %cst_11 = arith.constant 0.000000e+00 : f32
    %26 = vector.broadcast %cst_11 : f32 to vector<8x200xf32>
    %27 = arith.select %25, %3, %26 : vector<8x200xi1>, vector<8x200xf32>
    %cst_12 = arith.constant dense<0.000000e+00> : vector<8xf32>
    %28 = vector.multi_reduction <add>, %27, %cst_12 [1] : vector<8x200xf32> to vector<8xf32>
    %29 = vector.shape_cast %28 : vector<8xf32> to vector<8x1xf32>
    %c0_13 = arith.constant 0 : index
    %c0_14 = arith.constant 0 : index
    %30 = vector.load %arg7[%c0_13, %c0_14] : memref<8x1xf32, #tpu.memory_space<vmem>>, vector<8x1xf32>
    %31 = arith.addf %30, %29 : vector<8x1xf32>
    %c0_15 = arith.constant 0 : index
    %c0_16 = arith.constant 0 : index
    %32 = vector.load %arg7[%c0_15, %c0_16] : memref<8x1xf32, #tpu.memory_space<vmem>>, vector<8x1xf32>
    tpu.vector_store %arg7[%c0_15, %c0_16], %31 {strides = array<i32>} : memref<8x1xf32, #tpu.memory_space<vmem>>, vector<8x1xf32>,
    %c0_17 = arith.constant 0 : index
    %c0_18 = arith.constant 0 : index
    %33 = vector.load %arg5[%c0_17, %c0_18] : memref<8x1xf32, #tpu.memory_space<vmem>>, vector<8x1xf32>
    tpu.vector_store %arg5[%c0_17, %c0_18], %9 {strides = array<i32>} : memref<8x1xf32, #tpu.memory_space<vmem>>, vector<8x1xf32>,
    %c0_i32_19 = arith.constant 0 : i32
    %34 = arith.cmpi eq, %arg1, %c0_i32_19 : i32
    %35 = arith.extui %34 : i1 to i32
    %c0_i32_20 = arith.constant 0 : i32
    %36 = arith.cmpi ne, %35, %c0_i32_20 : i32
    scf.if %36 {
      %c0_21 = arith.constant 0 : index
      %c0_22 = arith.constant 0 : index
      %37 = vector.load %arg3[%c0_21, %c0_22] : memref<8x1xi32, #tpu.memory_space<vmem>>, vector<8x1xi32>
      %c0_23 = arith.constant 0 : index
      %c0_24 = arith.constant 0 : index
      %38 = vector.load %arg5[%c0_23, %c0_24] : memref<8x1xf32, #tpu.memory_space<vmem>>, vector<8x1xf32>
      %c0_25 = arith.constant 0 : index
      %c0_26 = arith.constant 0 : index
      %39 = vector.load %arg6[%c0_25, %c0_26] : memref<8x1xf32, #tpu.memory_space<vmem>>, vector<8x1xf32>
      %c0_27 = arith.constant 0 : index
      %c0_28 = arith.constant 0 : index
      %40 = vector.load %arg7[%c0_27, %c0_28] : memref<8x1xf32, #tpu.memory_space<vmem>>, vector<8x1xf32>
      %41 = math.log %39 : vector<8x1xf32>
      %42 = arith.addf %38, %41 : vector<8x1xf32>
      %c0_i32_29 = arith.constant 0 : i32
      %43 = vector.broadcast %c0_i32_29 : i32 to vector<8x1xi32>
      %44 = arith.cmpi ne, %37, %43 : vector<8x1xi32>
      %45 = arith.subf %42, %40 : vector<8x1xf32>
      %cst_30 = arith.constant 0.000000e+00 : f32
      %46 = vector.broadcast %cst_30 : f32 to vector<8x1xf32>
      %47 = arith.select %44, %45, %46 : vector<8x1xi1>, vector<8x1xf32>
      %48 = arith.extui %44 : vector<8x1xi1> to vector<8x1xi32>
      %49 = arith.sitofp %48 : vector<8x1xi32> to vector<8x1xf32>
      %50 = tpu.iota {dimensions = array<i32: 1>} : vector<8x2xi32>
      %c0_i32_31 = arith.constant 0 : i32
      %51 = vector.broadcast %c0_i32_31 : i32 to vector<8x2xi32>
      %52 = arith.cmpi eq, %50, %51 : vector<8x2xi32>
      %53 = vector.shape_cast %47 : vector<8x1xf32> to vector<8x1xf32>
      %54 = vector.broadcast %53 : vector<8x1xf32> to vector<8x2xf32>
      %55 = vector.shape_cast %49 : vector<8x1xf32> to vector<8x1xf32>
      %56 = vector.broadcast %55 : vector<8x1xf32> to vector<8x2xf32>
      %57 = arith.select %52, %54, %56 : vector<8x2xi1>, vector<8x2xf32>
      %cst_32 = arith.constant dense<0.000000e+00> : vector<2xf32>
      %58 = vector.multi_reduction <add>, %57, %cst_32 [0] : vector<8x2xf32> to vector<2xf32>
      %59 = vector.shape_cast %58 : vector<2xf32> to vector<1x2xf32>
      %60 = vector.shape_cast %59 : vector<1x2xf32> to vector<1x1x2xf32>
      %c0_33 = arith.constant 0 : index
      %c0_34 = arith.constant 0 : index
      %c0_35 = arith.constant 0 : index
      %61 = vector.load %arg4[%c0_33, %c0_34, %c0_35] : memref<1x1x2xf32, #tpu.memory_space<vmem>>, vector<1x1x2xf32>
      tpu.vector_store %arg4[%c0_33, %c0_34, %c0_35], %60 {strides = array<i32>} : memref<1x1x2xf32, #tpu.memory_space<vmem>>, vector<1x1x2xf32>,
    } else {
    }
    return
  }
  func.func @transform_0(%arg0: i32, %arg1: i32) -> (i32, i32) {
    %c0_i32 = arith.constant 0 : i32
    return %arg0, %arg1 : i32, i32
  }
  func.func @transform_1(%arg0: i32, %arg1: i32) -> (i32, i32) {
    %c0_i32 = arith.constant 0 : i32
    %c0_i32_0 = arith.constant 0 : i32
    return %arg0, %c0_i32 : i32, i32
  }
  func.func @transform_2(%arg0: i32, %arg1: i32) -> (i32, i32, i32) {
    %c0_i32 = arith.constant 0 : i32
    %c0_i32_0 = arith.constant 0 : i32
    %c0_i32_1 = arith.constant 0 : i32
    return %arg0, %c0_i32, %c0_i32_0 : i32, i32, i32
  }
}

</mosaic_0001>

<bundles_post_ra>
// kernel: tpu_custom_call.1
= control target key start
LH: loop header
LB: loop body
LE: loop exit
PB: predicated region body
PF: predicated region fallthrough
CT: control target
= control target key end

     0   :  { %7 = vsyncpa [#allocation6], 0  ;;  %s699_s0 = inlined_call_operand.hbm [shape: f32[18,200], index: 0, kind: input, shape index: {}]   ;;  %s700_s1 = inlined_call_operand.vmem [shape: s32[24,1], index: 1, kind: input, shape index: {}]   ;;  %s701_s2 = inlined_call_operand.vmem [shape: f32[3,1,2], index: 2, kind: output, shape index: {}]  }
   0x1   :  { %9 = vsyncpa [#allocation6 + $0x1], 0  ;;  %s556_s9 = smov 0   ;;  %s558_s10 = smov 0  }
   0x2   :  { %s560_s11 = smov 0   ;;  %s562_s12 = smov 0  }
   0x3   :  { %s564_s13 = smov 0   ;;  %s566_s14 = smov 0  }
   0x4 LB: > { %s373_s15 = sadd.s32 4294967295, %s535_s14   ;;  %s27_s16 = sadd.s32 1, %s531_s13  ;;  %s535_s14 = sphi %s566_s14, %s15_s14   ;;  %s531_s13 = sphi %s564_s13, %s711_s13   ;;  %s527_s12 = sphi %s562_s12, %s710_s12   ;;  %s523_s11 = sphi %s560_s11, %s709_s11   ;;  %s519_s10 = sphi %s558_s10, %s708_s10   ;;  %s515_s9 = sphi %s556_s9, %s707_s9  }
   0x5   : > { %p29_p0 = scmp.ge.s32.totalorder %s27_s16, 3  ;;  %s36_s17 = sadd.s32 1, %s523_s11 }
   0x6   : > { %p43_p1 = scmp.ne.s32.totalorder %s523_s11, %s519_s10  ;;  %p44_p2 = scmp.eq.s32.totalorder %s535_s14, 0 }
   0x7   : > { %s713_s16 = smov (%p29_p0, %s27_s16), 0  ;;  %p49_p4 = scmp.ne.s32.totalorder %s519_s10, %s515_s9 }
   0x8   : > { %p592_p3 = por %p44_p2, %p43_p1  ;;  %s31_s19 = ssub.s32 %s531_s13, %s713_s16 }
   0x9   : > { %p50_p5 = scmp.eq.s32.totalorder %s373_s15, 0  ;;  %p34_p6 = scmp.eq.s32.totalorder %s31_s19, 0 }
   0xa   : > { %p393_p8 = scmp.lt.s32.totalorder %s535_s14, 3  ;;  %s125_s22 = sand.u32 1, %s523_s11  }
   0xb   : > { %p599_p7 = por %p50_p5, %p49_p4  ;;  %s386_s23 = sshll.u32 %s531_s13, 8 }
   0xc   : > { %s605_s21 = scalar_select %p34_p6, %s523_s11, %s36_s17  }
   0xd   : > { %s377_s24 = sshll.u32 %s125_s22, 4  ;;  %s612_s27 = scalar_lea.hbm %s699_s0, %s386_s23 }
   0xe   : > { %s129_s28 = scalar_lea.vmem [#allocation5], %s377_s24  ;;  %p616_p9 = pnand %p393_p8, %p592_p3 }
   0xf   : > { %s139_s29 = sshll.u32 %s129_s28, 4  ;;  %s126_s3 = scalar_lea.sflag [#allocation6], %s125_s22  ;;  %s620_s29 = int_to_ptr.vmem [resolvable:$true] %s139_s29 }
  0x10   : > { %s455_s4 = scalar_lea.hbm %s612_s27, 256  ;;  %p457_p13 = pneg %p616_p9 }
  0x11   : > { %p456_p12 = scmp.ne.s32.totalorder %s612_s27, %s455_s4  ;;  %s460_s7 = scalar_lea.hbm %s699_s0, 768 }
  0x12   : > { %p461_p2 = scmp.lt.u32.totalorder %s612_s27, %s699_s0  ;;  %p462_p3 = scmp.lt.u32.totalorder %s460_s7, %s455_s4 }
  0x13   : > { %p458_p0 = pnand %p457_p13, %p456_p12  ;;  %p464_p5 = scmp.lt.u32.totalorder %s455_s4, %s612_s27 }
  0x14   : > { %p463_p4 = por %p462_p3, %p461_p2 }
  0x15   : > { %p459_p1 = pneg %p458_p0 }
  0x16   : > { %p465_p6 = por %p464_p5, %p463_p4 }
  0x18   : > { %p466_p8 = pnand %p465_p6, %p459_p1 }
  0x1a   : > { %469 = shalt.err (!%p466_p8)
}
  0x1b   : > { %s470_s15 = scalar_lea.vmem %s620_s29, 256  ;;  %s537_s17 = smov [#allocation5]  }
  0x1c   : > { %p471_p12 = scmp.ne.s32.totalorder %s620_s29, %s470_s15  ;;  %s475_s18 = sshll.u32 %s537_s17, 4  ;;  %s476_s18 = int_to_ptr.vmem [resolvable:$false] %s475_s18 }
  0x1d   : > { %s477_s19 = scalar_lea.vmem %s476_s18, 512  ;;  %p478_p11 = scmp.lt.s32.totalorder %s620_s29, %s476_s18 }
  0x1e   : > { %p473_p0 = pnand %p471_p12, %p457_p13  ;;  %p479_p2 = scmp.lt.s32.totalorder %s477_s19, %s470_s15 }
  0x20   : > { %p474_p10 = pneg %p473_p0  ;;  %p480_p3 = por %p479_p2, %p478_p11 }
  0x22   : > { %p481_p4 = pnand %p480_p3, %p474_p10 }
  0x24   : > { %484 = shalt.err (!%p481_p4)
}
  0x25   : > { %392 = dma.hbm_to_vmem [thread:$0]  (!%p616_p9), %s612_s27, 256, %s620_s29, %s126_s3  }
  0x26   : > { %p705_p1 = scmp.lt.s32.totalorder %s535_s14, 4  ;;  %p706_p5 = scmp.ge.s32.totalorder %s535_s14, 1 }
  0x28   : > { %p152_p13 = pnand %p706_p5, %p705_p1 }
  0x29   : > { %s157_s22 = sand.u32 (!%p152_p13), 1, %s519_s10  }
  0x2a   : > { %155 = sbr.rel (%p152_p13) target bundleno = 658 (0x292), region = 28  ;;  %s381_s23 = sshll.u32 (!%p152_p13), %s157_s22, 4 }
  0x2b   : > { %s158_s24 = scalar_lea.sflag (!%p152_p13), [#allocation6], %s157_s22  ;;  %s161_s25 = scalar_lea.vmem (!%p152_p13), [#allocation5], %s381_s23 }
  0x31   : > { %510 = dma.done.wait (%p599_p7), %s158_s24, 256  }
  0x32   : > { %512 = vsyncadd (%p599_p7), %s158_s24, 4294967040  ;;  %vm196_vm0 = vcmask 7168   ;;  %v538_v0 = vmov -inf   ;;  %vm206_vm1 = vcmask 588800   ;;  %v200_v1 = vld [vmem:[%s161_s25] sm:$0xff]  ;;  %v201_v2 = vld [vmem:[%s161_s25 + $0x8] sm:$0xff]  ;;  %v203_v13 = vlaneseq }
  0x33   : > { %197 = vst.msk [vmem:[#allocation2] sm:$0xff] %vm196_vm0, %v538_v0  ;;  %v207_v3 = vsel %vm206_vm1, %v201_v2, -inf  ;;  %p185_p9 = scmp.lt.s32.totalorder %s527_s12, 2  ;;  %v539_v5 = vmov 0   ;;  %v540_v7 = vmov 0.0   ;;  %vm281_vm6 = vcmask 15360  }
  0x34   : > { %v208_v4 = vmax.f32 %v200_v1, %v207_v3  ;;  %445 = vset.pattern.permute.xlu0 %v539_v5  ;;  %446 = vset.pattern.permute.xlu1 %v539_v5  ;;  %198 = vst.msk [vmem:[#allocation3] sm:$0xff] %vm196_vm0, %v540_v7  ;;  %199 = vst.msk [vmem:[#allocation4] sm:$0xff] %vm196_vm0, %v540_v7  ;;  %v204_v19 = vand.u32 127, %v203_v13  ;;  %vm289_vm7 = vcmask 8192  }
  0x35   : > { %s715_s12 = smov (!%p185_p9, %s527_s12), 2 }
  0x36   : > { %209 = vmax.xlane.f32.xlu0 %v208_v4  ;;  %s382_s20 = sshll.u32 %s715_s12, 3  ;;  %v205_v20 = vadd.s32 128, %v204_v19  ;;  %vm269_vm5 = vcmp.eq.s32.totalorder %v204_v19, 0  ;;  %s191_s3 = scalar_lea.vmem %s701_s2, %s715_s12 }
  0x37   : > { %s188_s28 = scalar_lea.vmem %s700_s1, %s382_s20 }
  0x38   : > { %v257_v6 = vld [vmem:[%s188_s28] sm:$0xff] }
  0x39   : > { %240 = vperm.xlu1 %446, %v257_v6   ;;  %vm264_vm2 = vcmp.ne.s32.totalorder %v257_v6, 0 }
  0x3a   : > { %v211_v8 = vld [vmem:[#allocation2] sm:$0xff]  ;;  %v383_v12 = vsel %vm264_vm2, 1.0, %v540_v7 }
  0x3b   : > { %v213_v32 = vld [vmem:[#allocation3] sm:$0xff]  ;;  %v250_v36 = vld [vmem:[#allocation4] sm:$0xff] }
  0xb8   : > { %v241_v21 = vpop.permute.xlu1 %240 }
  0xb9   : > { %vm243_vm3 = vcmp.eq.s32.totalorder %v205_v20, %v241_v21  ;;  %vm242_vm4 = vcmp.eq.s32.totalorder %v204_v19, %v241_v21 }
  0xba   : > { %v245_v22 = vsel %vm243_vm3, %v201_v2, 0.0  ;;  %v244_v26 = vsel %vm242_vm4, %v200_v1, 0.0 }
  0xbb   : > { %v246_v27 = vsel %vm206_vm1, %v245_v22, 0.0 }
  0xbc   : > { %v247_v29 = vadd.f32 %v246_v27, %v244_v26 }
  0xc3   : > { %v210_v9 = vpop.xlane.xlu0 %209 }
  0xc4   : > { %v212_v10 = vmax.f32 %v211_v8, %v210_v9 }
  0xc6   : > { %v214_v11 = vsub.f32 %v211_v8, %v212_v10  ;;  %253 = vst.msk [vmem:[#allocation2] sm:$0xff] %vm196_vm0, %v212_v10  ;;  %220 = vperm.xlu0 %445, %v212_v10  }
  0xc8   : > { %v215_v30 = vmul.f32 1.442695, %v214_v11 }
  0xca   : > { %277 = vperm.xlu0 %445, %v383_v12  }
  0xcd   : > { %v258_v42 = vld [vmem:[#allocation2] sm:$0xff] }
 0x145   : > { %v221_v14 = vpop.permute.xlu0 %220 }
 0x146   : > { %v223_v15 = vsub.f32 %v200_v1, %v221_v14  ;;  %v224_v16 = vsub.f32 %v201_v2, %v221_v14 }
 0x148   : > { %v225_v17 = vmul.f32 1.442695, %v223_v15  ;;  %v227_v18 = vmul.f32 1.442695, %v224_v16 }
 0x149   : > { %v278_v47 = vpop.permute.xlu0 %277 }
 0x14a   : > { %447 = vpow2.f32 %v225_v17 }
 0x14b   : > { %449 = vpow2.f32 %v227_v18 }
 0x14c   : > { %451 = vpow2.f32 %v215_v30 }
 0x154   : > { %v448_v23 = vpop.eup %447 }
 0x155   : > { %v450_v24 = vpop.eup %449 }
 0x156   : > { %v229_v25 = vsel %vm206_vm1, %v450_v24, 0.0  ;;  %v452_v31 = vpop.eup %451 }
 0x157   : > { %v230_v28 = vadd.f32 %v448_v23, %v229_v25  ;;  %v217_v33 = vmul.f32 %v452_v31, %v213_v32 }
 0x159   : > { %231 = vadd.xlane.f32.xlu1 %v230_v28 }
 0x15d   : > { %248 = vadd.xlane.f32.xlu1 %v247_v29 }
 0x1e6   : > { %v232_v34 = vpop.xlane.xlu1 %231 }
 0x1e7   : > { %v233_v35 = vadd.f32 %v232_v34, %v217_v33 }
 0x1e9   : > { %235 = vst.msk [vmem:[#allocation3] sm:$0xff] %vm196_vm0, %v233_v35 }
 0x1ea   : > { %v249_v37 = vpop.xlane.xlu1 %248 }
 0x1eb   : > { %v251_v38 = vadd.f32 %v250_v36, %v249_v37 }
 0x1ed   : > { %252 = vst.msk [vmem:[#allocation4] sm:$0xff] %vm196_vm0, %v251_v38 }
 0x1f0   : > { %v259_v39 = vld [vmem:[#allocation3] sm:$0xff] }
 0x1f1   : > { %453 = vlog2.f32 %v259_v39 }
 0x1f4   : > { %v260_v43 = vld [vmem:[#allocation4] sm:$0xff] }
 0x1fb   : > { %v454_v40 = vpop.eup %453 }
 0x1fc   : > { %v262_v41 = vmul.f32 0.6931472, %v454_v40 }
 0x1fe   : > { %v263_v44 = vadd.f32 %v262_v41, %v258_v42 }
 0x200   : > { %v265_v45 = vsub.f32 %v263_v44, %v260_v43 }
 0x202   : > { %v266_v46 = vsel %vm264_vm2, %v265_v45, 0.0 }
 0x203   : > { %272 = vperm.xlu1 %446, %v266_v46  }
 0x282   : > { %v273_v48 = vpop.permute.xlu1 %272 }
 0x283   : > { %v280_v49 = vsel %vm269_vm5, %v273_v48, %v278_v47 }
 0x284   : > { %v282_v50 = vsel %vm281_vm6, %v280_v49, 0.0 }
 0x285   : > { %v283_v51 = vrot.slane %v282_v50, 4 }
 0x287   : > { %v284_v52 = vadd.f32 %v283_v51, %v282_v50 }
 0x289   : > { %v285_v53 = vrot.slane %v284_v52, 2 }
 0x28b   : > { %v286_v54 = vadd.f32 %v285_v53, %v284_v52 }
 0x28d   : > { %v287_v55 = vrot.slane %v286_v54, 1 }
 0x28f   : > { %v288_v56 = vadd.f32 %v287_v55, %v286_v54 }
 0x291   : > { %290 = vst.msk [vmem:[%s191_s3] sm:$0x1] %vm289_vm7, %v288_v56 }
 0x292 PF: > { %s15_s14 = sadd.s32 1, %s535_s14   ;;  %s707_s9 = smov %s519_s10 }
 0x293   : > { %p12_p7 = scmp.ge.s32.totalorder %s15_s14, 5   ;;  %s708_s10 = smov %s523_s11 }
 0x294   : > { %s709_s11 = smov %s605_s21  ;;  %s710_s12 = smov %s531_s13 }
 0x295   : > { %s711_s13 = smov %s713_s16  ;;  %14 = sbr.rel (!%p12_p7) target bundleno = 4 (0x4), region = 79 }
 0x29c   :  { %308 = vsyncpa [#allocation6], 1 }
 0x29d   :  { %310 = vsyncpa [#allocation6 + $0x1], 1 }

</bundles_post_ra>
